<compile_context>
chip_gen: v5e
topology: v5e:2x2
jax: 0.10.0
libtpu: 0.0.40
codegen_flags: <defaults>
</compile_context>

<pallas_src>
import functools

import jax
import jax.numpy as jnp
from jax import lax
from jax.experimental import pallas as pl
from jax.experimental.pallas import tpu as pltpu

LANES = 128                 # fixed lane width; 32 RGBA pixels per row
MAX_SUBLANE_TILE = 1024     # (1024,128) f32 block = 512 KiB  (~2 MiB moved / step)


def _pick_sublane_tile(s_total, batch, granule, max_tile=MAX_SUBLANE_TILE,
                       min_steps=4):
    """Balanced sublane tile: near-equal full blocks (no half-empty masked tail),
    at least `min_steps` grid steps when possible (keeps both v7x TensorCores
    fed for small batches), rounded up to the layout granule."""
    n = max(pl.cdiv(s_total, max_tile), 1)
    max_n = max(pl.cdiv(s_total, granule), 1)
    while batch * n < min_steps and n < max_n:
        n += 1
    tile = pl.cdiv(s_total, n)
    return pl.cdiv(tile, granule) * granule


# ---------------------------------------------------------------------------
# Kernel: alpha blend + masking on interleaved-RGBA tiles
# ---------------------------------------------------------------------------
def _blend_kernel(ori_ref, r_ref, x_rgba_ref, x3_ref, ori3_ref):
    """One (TS, 128) tile; lane l holds channel (l % 4) of pixel (l // 4)."""
    ori = ori_ref[0].astype(jnp.float32)            # (TS, 128)
    rr = r_ref[0].astype(jnp.float32)               # (TS, 128)

    # Group-broadcast selector: sel[i, j] = 1 iff i is the alpha lane of j's pixel.
    ii = lax.broadcasted_iota(jnp.int32, (LANES, LANES), 0)
    jj = lax.broadcasted_iota(jnp.int32, (LANES, LANES), 1)
    sel = (((ii & 3) == 3) & ((ii >> 2) == (jj >> 2))).astype(jnp.bfloat16)

    def bcast_alpha(x_bf16):                        # (TS,128)bf16 @ (128,128)bf16 on the MXU
        return jnp.dot(x_bf16, sel, preferred_element_type=jnp.float32)

    # ori-alpha > 0 mask via an exact 0/1 indicator (exact under any MXU precision).
    mask = bcast_alpha((ori > 0.0).astype(jnp.bfloat16)) > 0.5

    # r-alpha value via bf16 hi/lo split (<= ~1e-3 absolute error through the MXU).
    r_hi = rr.astype(jnp.bfloat16)
    r_lo = (rr - r_hi.astype(jnp.float32)).astype(jnp.bfloat16)
    r_alpha = bcast_alpha(r_hi) + bcast_alpha(r_lo)

    blend = ori + rr * (r_alpha * (1.0 / 255.0))
    x4 = jnp.where(mask, blend, 0.0)

    lane = lax.broadcasted_iota(jnp.int32, ori.shape, 1)
    is_alpha_lane = (lane & 3) == 3
    # x_rgba: masked rgb blend on rgb lanes, original ori alpha on alpha lanes.
    x_rgba_ref[0] = jnp.where(is_alpha_lane, ori, x4).astype(x_rgba_ref.dtype)
    # 3-channel classifier inputs (alpha lanes are don't-care, dropped downstream).
    x3_ref[0] = jnp.where(mask, blend, 255.0).astype(x3_ref.dtype)
    ori3_ref[0] = jnp.where(mask, ori, 255.0).astype(ori3_ref.dtype)


def _blend_interleaved(ori_il, r_il):
    """ori_il, r_il: (B, S, 128) interleaved-RGBA rows (32 pixels per row)."""
    B, S, _ = ori_il.shape
    granule = 32 if (ori_il.dtype.itemsize < 4 or r_il.dtype.itemsize < 4) else 8
    tile = _pick_sublane_tile(S, B, granule)
    n_t = pl.cdiv(S, tile)

    spec = pl.BlockSpec((1, tile, LANES), lambda b, t: (b, t, 0))

    return pl.pallas_call(
        _blend_kernel,
        out_shape=(
            jax.ShapeDtypeStruct((B, S, LANES), jnp.float32),    # x_rgba (interleaved)
            jax.ShapeDtypeStruct((B, S, LANES), jnp.bfloat16),   # cla_x   (interleaved, 4ch)
            jax.ShapeDtypeStruct((B, S, LANES), jnp.bfloat16),   # cla_ori (interleaved, 4ch)
        ),
        grid=(B, n_t),
        in_specs=[spec, spec],
        out_specs=(spec, spec, spec),
        compiler_params=pltpu.CompilerParams(
            dimension_semantics=("parallel", "parallel")),
    )(ori_il, r_il)


# ---------------------------------------------------------------------------
# Layout helpers (bit-reshapes; a copy only when H*W % 32 != 0)
# ---------------------------------------------------------------------------
def _interleaved_view(x_nhwc):
    B, H, W, C = x_nhwc.shape
    n = H * W * C
    flat = x_nhwc.reshape(B, n)
    pad = (-n) % LANES
    if pad:
        flat = jnp.pad(flat, ((0, 0), (0, pad)))
    return flat.reshape(B, (n + pad) // LANES, LANES), n


def _nhwc_from_interleaved(x_il, n, B, H, W):
    flat = x_il.reshape(B, -1)
    if flat.shape[1] != n:
        flat = flat[:, :n]
    return flat.reshape(B, H, W, 4)


# ---------------------------------------------------------------------------
# Forward (glue around the kernel)
# ---------------------------------------------------------------------------
@functools.partial(jax.jit, static_argnames=("model_name",))
def gauss_get_img_forward(ori_img, r, head_w, head_b, model_name="inception"):
    """ori_img, r: (B, H, W, 4) NHWC RGBA arrays (float32 or uint8)."""
    B, H, W, C = ori_img.shape
    assert C == 4 and r.shape == ori_img.shape

    ori_il, n = _interleaved_view(ori_img)
    r_il, _ = _interleaved_view(r)
    x_rgba_il, x3_il, ori3_il = _blend_interleaved(ori_il, r_il)

    x_rgba = _nhwc_from_interleaved(x_rgba_il, n, B, H, W)       # (B,H,W,4) f32
    cla_x_4 = _nhwc_from_interleaved(x3_il, n, B, H, W)          # bf16, 4th ch = don't-care
    cla_ori_4 = _nhwc_from_interleaved(ori3_il, n, B, H, W)

    # Resize (bilinear) glue matching the module's model_name branches; the
    # don't-care 4th channel rides along and is dropped on the small resized image.
    out_hw = 224 if model_name == "vit_b_16" else 299
    cla_x_3 = jax.image.resize(cla_x_4, (B, out_hw, out_hw, 4),
                               method="bilinear")[..., :3]
    cla_ori_3 = jax.image.resize(cla_ori_4, (B, out_hw, out_hw, 4),
                                 method="bilinear")[..., :3]

    # TODO(synk): self.model is an external classifier; stubbed with GAP + linear.
    feat_x = cla_x_3.astype(jnp.float32).mean(axis=(1, 2))       # (B, 3)
    feat_ori = cla_ori_3.astype(jnp.float32).mean(axis=(1, 2))   # (B, 3)
    cla = feat_x @ head_w + head_b
    ori_cla = feat_ori @ head_w + head_b

    ori_img_f = jnp.asarray(ori_img, jnp.float32)   # the module returns the float copy
    return r, x_rgba, cla, ori_img_f, ori_cla


# ---------------------------------------------------------------------------
# Pure-JAX reference + checks
# ---------------------------------------------------------------------------
def _ref_blend_nhwc(ori_img, r):
    ori_img = ori_img.astype(jnp.float32)
    r = r.astype(jnp.float32)
    alpha = r[..., 3:4] / 255.0
    ori_a = ori_img[..., 3:4]
    x_rgb = ori_img[..., :3] + r[..., :3] * alpha
    x_rgb = jnp.where(ori_a > 0, x_rgb, 0.0)
    x_rgba = jnp.concatenate([x_rgb, ori_a], axis=-1)
    x3 = jnp.where(ori_a > 0, x_rgb, 255.0)
    ori3 = jnp.where(ori_a > 0, ori_img[..., :3], 255.0)
    return x_rgba, x3, ori3


def _check_blend(ori_img, r):
    B, H, W, _ = ori_img.shape
    ori_il, n = _interleaved_view(ori_img)
    r_il, _ = _interleaved_view(r)
    x_rgba_il, x3_il, ori3_il = jax.block_until_ready(_blend_interleaved(ori_il, r_il))
    x_rgba = _nhwc_from_interleaved(x_rgba_il, n, B, H, W)
    x3 = _nhwc_from_interleaved(x3_il, n, B, H, W)[..., :3].astype(jnp.float32)
    ori3 = _nhwc_from_interleaved(ori3_il, n, B, H, W)[..., :3].astype(jnp.float32)
    ref_rgba, ref_x3, ref_ori3 = _ref_blend_nhwc(ori_img, r)
    # x_rgba is f32; tolerance covers the bf16 hi/lo alpha-broadcast path (<=~1e-3 abs).
    assert jnp.allclose(x_rgba, ref_rgba, atol=2e-2, rtol=1e-3), "x_rgba mismatch"
    # x3 / ori3 are emitted as bf16 -> bf16-level tolerance.
    assert jnp.allclose(x3, ref_x3, atol=2.0, rtol=8e-3), "cla_x mismatch"
    assert jnp.allclose(ori3, ref_ori3, atol=2.0, rtol=8e-3), "cla_ori mismatch"


if __name__ == "__main__":
    keys = jax.random.split(jax.random.PRNGKey(0), 16)

    # --- full forward on small NHWC RGBA inputs (batch=2, 16x16) -------------
    B, H, W = 2, 16, 16
    ori_img = jax.random.uniform(keys[0], (B, H, W, 4), jnp.float32, 0.0, 255.0)
    amask = (jax.random.uniform(keys[1], (B, H, W)) > 0.3).astype(jnp.float32)
    ori_img = ori_img.at[..., 3].multiply(amask)     # zero alpha on ~30% of pixels
    r = jax.random.uniform(keys[2], (B, H, W, 4), jnp.float32, 0.0, 255.0)

    K = 16
    head_w = jax.random.normal(keys[3], (3, K), jnp.float32) * 0.01
    head_b = jnp.zeros((K,), jnp.float32)

    outs = jax.block_until_ready(
        gauss_get_img_forward(ori_img, r, head_w, head_b, model_name="inception"))
    r_out, x_rgba, cla, ori_out, ori_cla = outs

    ref_x_rgba, _, _ = _ref_blend_nhwc(ori_img, r)
    assert x_rgba.shape == (B, H, W, 4)
    assert jnp.allclose(x_rgba, ref_x_rgba, atol=2e-2, rtol=1e-3), "forward blend mismatch"
    assert cla.shape == (B, K) and ori_cla.shape == (B, K)
    assert jnp.allclose(ori_out, ori_img)
    assert bool(jnp.all(jnp.isfinite(cla))) and bool(jnp.all(jnp.isfinite(ori_cla)))

    # --- direct kernel checks -------------------------------------------------
    _check_blend(ori_img, r)                         # tiny single-tile case

    # multi-tile grid: balanced full blocks, >=4 grid steps (v7x dual-TC path)
    ori_m = jax.random.uniform(keys[4], (1, 64, 96, 4), jnp.float32, 0.0, 255.0)
    ori_m = ori_m.at[..., 3].multiply(
        (jax.random.uniform(keys[5], (1, 64, 96)) > 0.5).astype(jnp.float32))
    r_m = jax.random.uniform(keys[6], (1, 64, 96, 4), jnp.float32, 0.0, 255.0)
    _check_blend(ori_m, r_m)

    # H*W not a multiple of 32 -> padded flat view + masked boundary block
    ori_o = jax.random.uniform(keys[7], (1, 13, 29, 4), jnp.float32, 0.0, 255.0)
    ori_o = ori_o.at[..., 3].multiply(
        (jax.random.uniform(keys[8], (1, 13, 29)) > 0.5).astype(jnp.float32))
    r_o = jax.random.uniform(keys[9], (1, 13, 29, 4), jnp.float32, 0.0, 255.0)
    _check_blend(ori_o, r_o)

    # uint8 sources: read as u8, cast to f32 inside the kernel (4x less input HBM)
    ou = jnp.round(jax.random.uniform(keys[10], (2, 32, 32, 4), jnp.float32, 0.0, 255.0))
    ou = ou.at[..., 3].multiply(
        (jax.random.uniform(keys[11], (2, 32, 32)) > 0.4).astype(jnp.float32))
    ru = jnp.round(jax.random.uniform(keys[12], (2, 32, 32, 4), jnp.float32, 0.0, 255.0))
    _check_blend(ou.astype(jnp.uint8), ru.astype(jnp.uint8))

    print("KERNEL_OK")
</pallas_src>

<mosaic_0001>
module attributes {stable_mosaic.version = 11 : i64} {
  func.func @_blend_kernel(%arg0: i32, %arg1: i32, %arg2: memref<1x8x128xf32, #tpu.memory_space<vmem>>, %arg3: memref<1x8x128xf32, #tpu.memory_space<vmem>>, %arg4: memref<1x8x128xf32, #tpu.memory_space<vmem>>, %arg5: memref<1x8x128xbf16, #tpu.memory_space<vmem>>, %arg6: memref<1x8x128xbf16, #tpu.memory_space<vmem>>) attributes {dimension_semantics = [#tpu.dimension_semantics<parallel>, #tpu.dimension_semantics<parallel>], iteration_bounds = array<i64: 2, 1>, scalar_prefetch = 0 : i64, scratch_operands = 0 : i64, tpu.core_type = #tpu.core_type<tc>, window_params = [{transform_indices = @transform_0, window_bounds = array<i64: 1, 8, 128>}, {transform_indices = @transform_1, window_bounds = array<i64: 1, 8, 128>}, {transform_indices = @transform_2, window_bounds = array<i64: 1, 8, 128>}, {transform_indices = @transform_3, window_bounds = array<i64: 1, 8, 128>}, {transform_indices = @transform_4, window_bounds = array<i64: 1, 8, 128>}]} {
    %c0 = arith.constant 0 : index
    %c0_0 = arith.constant 0 : index
    %c0_1 = arith.constant 0 : index
    %0 = vector.load %arg2[%c0, %c0_0, %c0_1] : memref<1x8x128xf32, #tpu.memory_space<vmem>>, vector<1x8x128xf32>
    %1 = vector.shape_cast %0 : vector<1x8x128xf32> to vector<8x128xf32>
    %c0_2 = arith.constant 0 : index
    %c0_3 = arith.constant 0 : index
    %c0_4 = arith.constant 0 : index
    %2 = vector.load %arg3[%c0_2, %c0_3, %c0_4] : memref<1x8x128xf32, #tpu.memory_space<vmem>>, vector<1x8x128xf32>
    %3 = vector.shape_cast %2 : vector<1x8x128xf32> to vector<8x128xf32>
    %4 = tpu.iota {dimensions = array<i32: 0>} : vector<128x128xi32>
    %5 = tpu.iota {dimensions = array<i32: 1>} : vector<128x128xi32>
    %c3_i32 = arith.constant 3 : i32
    %6 = vector.broadcast %c3_i32 : i32 to vector<128x128xi32>
    %7 = arith.andi %4, %6 : vector<128x128xi32>
    %c3_i32_5 = arith.constant 3 : i32
    %8 = vector.broadcast %c3_i32_5 : i32 to vector<128x128xi32>
    %9 = arith.cmpi eq, %7, %8 : vector<128x128xi32>
    %c2_i32 = arith.constant 2 : i32
    %10 = vector.broadcast %c2_i32 : i32 to vector<128x128xi32>
    %11 = arith.shrsi %4, %10 : vector<128x128xi32>
    %c2_i32_6 = arith.constant 2 : i32
    %12 = vector.broadcast %c2_i32_6 : i32 to vector<128x128xi32>
    %13 = arith.shrsi %5, %12 : vector<128x128xi32>
    %14 = arith.cmpi eq, %11, %13 : vector<128x128xi32>
    %15 = arith.andi %9, %14 : vector<128x128xi1>
    %16 = arith.extui %15 : vector<128x128xi1> to vector<128x128xi32>
    %17 = arith.sitofp %16 : vector<128x128xi32> to vector<128x128xf32>
    %18 = arith.truncf %17 : vector<128x128xf32> to vector<128x128xbf16>
    %cst = arith.constant 0.000000e+00 : f32
    %19 = vector.broadcast %cst : f32 to vector<8x128xf32>
    %20 = arith.cmpf ogt, %1, %19 : vector<8x128xf32>
    %21 = arith.extui %20 : vector<8x128xi1> to vector<8x128xi32>
    %22 = arith.sitofp %21 : vector<8x128xi32> to vector<8x128xf32>
    %23 = arith.truncf %22 : vector<8x128xf32> to vector<8x128xbf16>
    %cst_7 = arith.constant dense<0.000000e+00> : vector<8x128xf32>
    %24 = tpu.matmul %23, %18, %cst_7 {dimension_numbers = #tpu.dot_dimension_numbers<[1], [0], [0], [1], [0, 0, 1, 1], [], []>} : vector<8x128xbf16>, vector<128x128xbf16>, vector<8x128xf32> -> vector<8x128xf32>
    %cst_8 = arith.constant 5.000000e-01 : f32
    %25 = vector.broadcast %cst_8 : f32 to vector<8x128xf32>
    %26 = arith.cmpf ogt, %24, %25 : vector<8x128xf32>
    %27 = arith.truncf %3 : vector<8x128xf32> to vector<8x128xbf16>
    %28 = arith.extf %27 : vector<8x128xbf16> to vector<8x128xf32>
    %29 = arith.subf %3, %28 : vector<8x128xf32>
    %30 = arith.truncf %29 : vector<8x128xf32> to vector<8x128xbf16>
    %cst_9 = arith.constant dense<0.000000e+00> : vector<8x128xf32>
    %31 = tpu.matmul %27, %18, %cst_9 {dimension_numbers = #tpu.dot_dimension_numbers<[1], [0], [0], [1], [0, 0, 1, 1], [], []>} : vector<8x128xbf16>, vector<128x128xbf16>, vector<8x128xf32> -> vector<8x128xf32>
    %cst_10 = arith.constant dense<0.000000e+00> : vector<8x128xf32>
    %32 = tpu.matmul %30, %18, %cst_10 {dimension_numbers = #tpu.dot_dimension_numbers<[1], [0], [0], [1], [0, 0, 1, 1], [], []>} : vector<8x128xbf16>, vector<128x128xbf16>, vector<8x128xf32> -> vector<8x128xf32>
    %33 = arith.addf %31, %32 : vector<8x128xf32>
    %cst_11 = arith.constant 0.00392156886 : f32
    %34 = vector.broadcast %cst_11 : f32 to vector<8x128xf32>
    %35 = arith.mulf %33, %34 : vector<8x128xf32>
    %36 = arith.mulf %3, %35 : vector<8x128xf32>
    %37 = arith.addf %1, %36 : vector<8x128xf32>
    %cst_12 = arith.constant 0.000000e+00 : f32
    %38 = vector.broadcast %cst_12 : f32 to vector<8x128xf32>
    %39 = arith.select %26, %37, %38 : vector<8x128xi1>, vector<8x128xf32>
    %40 = tpu.iota {dimensions = array<i32: 1>} : vector<8x128xi32>
    %c3_i32_13 = arith.constant 3 : i32
    %41 = vector.broadcast %c3_i32_13 : i32 to vector<8x128xi32>
    %42 = arith.andi %40, %41 : vector<8x128xi32>
    %c3_i32_14 = arith.constant 3 : i32
    %43 = vector.broadcast %c3_i32_14 : i32 to vector<8x128xi32>
    %44 = arith.cmpi eq, %42, %43 : vector<8x128xi32>
    %45 = arith.select %44, %1, %39 : vector<8x128xi1>, vector<8x128xf32>
    %c0_15 = arith.constant 0 : index
    %c0_16 = arith.constant 0 : index
    %c0_17 = arith.constant 0 : index
    %46 = vector.load %arg4[%c0_15, %c0_16, %c0_17] : memref<1x8x128xf32, #tpu.memory_space<vmem>>, vector<1x8x128xf32>
    %47 = vector.shape_cast %46 : vector<1x8x128xf32> to vector<8x128xf32>
    %48 = vector.shape_cast %45 : vector<8x128xf32> to vector<1x8x128xf32>
    tpu.vector_store %arg4[%c0_15, %c0_16, %c0_17], %48 {strides = array<i32>} : memref<1x8x128xf32, #tpu.memory_space<vmem>>, vector<1x8x128xf32>,
    %cst_18 = arith.constant 2.550000e+02 : f32
    %49 = vector.broadcast %cst_18 : f32 to vector<8x128xf32>
    %50 = arith.select %26, %37, %49 : vector<8x128xi1>, vector<8x128xf32>
    %51 = arith.truncf %50 : vector<8x128xf32> to vector<8x128xbf16>
    %c0_19 = arith.constant 0 : index
    %c0_20 = arith.constant 0 : index
    %c0_21 = arith.constant 0 : index
    %52 = vector.load %arg5[%c0_19, %c0_20, %c0_21] : memref<1x8x128xbf16, #tpu.memory_space<vmem>>, vector<1x8x128xbf16>
    %53 = vector.shape_cast %52 : vector<1x8x128xbf16> to vector<8x128xbf16>
    %54 = vector.shape_cast %51 : vector<8x128xbf16> to vector<1x8x128xbf16>
    tpu.vector_store %arg5[%c0_19, %c0_20, %c0_21], %54 {strides = array<i32>} : memref<1x8x128xbf16, #tpu.memory_space<vmem>>, vector<1x8x128xbf16>,
    %cst_22 = arith.constant 2.550000e+02 : f32
    %55 = vector.broadcast %cst_22 : f32 to vector<8x128xf32>
    %56 = arith.select %26, %1, %55 : vector<8x128xi1>, vector<8x128xf32>
    %57 = arith.truncf %56 : vector<8x128xf32> to vector<8x128xbf16>
    %c0_23 = arith.constant 0 : index
    %c0_24 = arith.constant 0 : index
    %c0_25 = arith.constant 0 : index
    %58 = vector.load %arg6[%c0_23, %c0_24, %c0_25] : memref<1x8x128xbf16, #tpu.memory_space<vmem>>, vector<1x8x128xbf16>
    %59 = vector.shape_cast %58 : vector<1x8x128xbf16> to vector<8x128xbf16>
    %60 = vector.shape_cast %57 : vector<8x128xbf16> to vector<1x8x128xbf16>
    tpu.vector_store %arg6[%c0_23, %c0_24, %c0_25], %60 {strides = array<i32>} : memref<1x8x128xbf16, #tpu.memory_space<vmem>>, vector<1x8x128xbf16>,
    return
  }
  func.func @transform_0(%arg0: i32, %arg1: i32) -> (i32, i32, i32) {
    %c0_i32 = arith.constant 0 : i32
    %c0_i32_0 = arith.constant 0 : i32
    return %arg0, %arg1, %c0_i32 : i32, i32, i32
  }
  func.func @transform_1(%arg0: i32, %arg1: i32) -> (i32, i32, i32) {
    %c0_i32 = arith.constant 0 : i32
    %c0_i32_0 = arith.constant 0 : i32
    return %arg0, %arg1, %c0_i32 : i32, i32, i32
  }
  func.func @transform_2(%arg0: i32, %arg1: i32) -> (i32, i32, i32) {
    %c0_i32 = arith.constant 0 : i32
    %c0_i32_0 = arith.constant 0 : i32
    return %arg0, %arg1, %c0_i32 : i32, i32, i32
  }
  func.func @transform_3(%arg0: i32, %arg1: i32) -> (i32, i32, i32) {
    %c0_i32 = arith.constant 0 : i32
    %c0_i32_0 = arith.constant 0 : i32
    return %arg0, %arg1, %c0_i32 : i32, i32, i32
  }
  func.func @transform_4(%arg0: i32, %arg1: i32) -> (i32, i32, i32) {
    %c0_i32 = arith.constant 0 : i32
    %c0_i32_0 = arith.constant 0 : i32
    return %arg0, %arg1, %c0_i32 : i32, i32, i32
  }
}

</mosaic_0001>

<bundles_post_ra>
// kernel: gauss_get_img_forward.1
= control target key start
LH: loop header
LB: loop body
LE: loop exit
PB: predicated region body
PF: predicated region fallthrough
CT: control target
= control target key end

     0   :  { %s818_s15 = smov 0   ;;  %s820_s16 = smov 0   ;;  %s1174_s0 = inlined_call_operand.vmem [shape: f32[2,8,128], index: 0, kind: input, shape index: {}]   ;;  %s1175_s1 = inlined_call_operand.vmem [shape: f32[2,8,128], index: 1, kind: input, shape index: {}]   ;;  %s1176_s2 = inlined_call_operand.vmem [shape: f32[2,8,128], index: 2, kind: output, shape index: {0}]   ;;  %s1177_s3 = inlined_call_operand.vmem [shape: bf16[2,8,128], index: 3, kind: output, shape index: {1}]   ;;  %s1178_s4 = inlined_call_operand.vmem [shape: bf16[2,8,128], index: 4, kind: output, shape index: {2}]  }
   0x1   :  { %s822_s17 = smov 0  }
   0x2 LB: > { %s27_s18 = sadd.s32 1, %s786_s16  ;;  %p668_p0 = scmp.ge.s32.totalorder %s790_s17, 1  ;;  %s790_s17 = sphi %s822_s17, %s15_s17   ;;  %s786_s16 = sphi %s820_s16, %s1250_s16   ;;  %s782_s15 = sphi %s818_s15, %s1249_s15  }
   0x3   : > { %p29_p1 = scmp.ge.s32.totalorder %s27_s18, 2  ;;  %p203_p2 = scmp.lt.s32.totalorder %s790_s17, 3 }
   0x5   : > { %s1252_s18 = smov (%p29_p1, %s27_s18), 0  ;;  %p204_p3 = pnand %p668_p0, %p203_p2 }
   0x6   : > { %p254_p4 = scmp.lt.s32.totalorder (!%p204_p3), %s782_s15, 1 }
   0x7   : > { %207 = sbr.rel (%p204_p3) target bundleno = 199 (0xc7), region = 28 }
   0xc   : > { %v291_v0 = vlaneseq  ;;  %v792_v33 = vmov 1.0|1.0   ;;  %s1254_s15 = smov (!%p254_p4, %s782_s15), 1 }
   0xd   : > { %s983_s19 = sshll.u32 %s1254_s15, 3  ;;  %s672_s26 = sshll.u32 %s1254_s15, 2 }
   0xe   : > { %v838_v1 = vshrl.u32 %v291_v0, 7  ;;  %v840_v2 = vand.u32 127, %v291_v0  ;;  %s267_s22 = scalar_lea.vmem %s1175_s1, %s983_s19  ;;  %s260_s25 = scalar_lea.vmem %s1174_s0, %s983_s19 }
   0xf   : > { %s288_s29 = scalar_lea.vmem %s1178_s4, %s672_s26  ;;  %s274_s6 = scalar_lea.vmem %s1176_s2, %s983_s19 }
  0x10   : > { %v306_v3 = vadd.s32 112, %v838_v1  ;;  %v307_v4 = vadd.s32 120, %v838_v1  ;;  %v845_v5 = vshra.s32 %v840_v2, 2  ;;  %v304_v6 = vadd.s32 96, %v838_v1  ;;  %s281_s9 = scalar_lea.vmem %s1177_s3, %s672_s26 }
  0x11   : > { %v305_v7 = vadd.s32 104, %v838_v1  ;;  %v302_v8 = vadd.s32 80, %v838_v1  ;;  %v303_v9 = vadd.s32 88, %v838_v1  ;;  %v300_v10 = vadd.s32 64, %v838_v1 }
  0x12   : > { %v324_v11 = vand.u32 3, %v306_v3  ;;  %v325_v12 = vand.u32 3, %v307_v4  ;;  %v356_v13 = vshra.s32 %v306_v3, 2  ;;  %v357_v14 = vshra.s32 %v307_v4, 2 }
  0x13   : > { %v322_v15 = vand.u32 3, %v304_v6  ;;  %v323_v16 = vand.u32 3, %v305_v7  ;;  %v354_v17 = vshra.s32 %v304_v6, 2  ;;  %v355_v18 = vshra.s32 %v305_v7, 2 }
  0x14   : > { %vm852_vm0 = vcmp.eq.s32.totalorder %v324_v11, 3  ;;  %vm856_vm1 = vcmp.eq.s32.totalorder %v325_v12, 3  ;;  %vm373_vm2 = vcmp.eq.s32.totalorder %v356_v13, %v845_v5  ;;  %vm374_vm3 = vcmp.eq.s32.totalorder %v357_v14, %v845_v5  ;;  %v290_v13 = vld [vmem:[%s267_s22] sm:$0xff] }
  0x15   : > { %vm389_vm4 = vmand %vm852_vm0, %vm373_vm2  ;;  %vm864_vm5 = vcmp.eq.s32.totalorder %v322_v15, 3  ;;  %vm868_vm6 = vcmp.eq.s32.totalorder %v323_v16, 3  ;;  %vm873_vm7 = vcmp.eq.s32.totalorder %v354_v17, %v845_v5  ;;  %vm878_vm8 = vcmp.eq.s32.totalorder %v355_v18, %v845_v5 }
  0x16   : > { %vm390_vm9 = vmand %vm856_vm1, %vm374_vm3  ;;  %v320_v25 = vand.u32 3, %v302_v8  ;;  %v321_v26 = vand.u32 3, %v303_v9  ;;  %v352_v27 = vshra.s32 %v302_v8, 2  ;;  %v353_v28 = vshra.s32 %v303_v9, 2 }
  0x17   : > { %vm691_vm10 = vmpackc.low %vm390_vm9, %vm389_vm4  ;;  %v301_v29 = vadd.s32 72, %v838_v1  ;;  %v318_v30 = vand.u32 3, %v300_v10  ;;  %v350_v31 = vshra.s32 %v300_v10, 2  ;;  %v298_v32 = vadd.s32 48, %v838_v1 }
  0x18   : > { %710 = vmatpush.bf16.msk.msra.mxu1 %vm691_vm10, %v792_v33  ;;  %726 = vmatpush.bf16.msk.msra.mxu2 %vm691_vm10, %v792_v33  ;;  %vm387_vm11 = vmand %vm864_vm5, %vm873_vm7  ;;  %vm893_vm12 = vcmp.eq.s32.totalorder %v320_v25, 3  ;;  %vm898_vm13 = vcmp.eq.s32.totalorder %v352_v27, %v845_v5  ;;  %vm907_vm15 = vcmp.eq.s32.totalorder %v321_v26, 3  ;;  %vm912_vm0 = vcmp.eq.s32.totalorder %v353_v28, %v845_v5  ;;  %v289_v28 = vld [vmem:[%s260_s25] sm:$0xff] }
  0x19   : > { %692 = vmatpush.bf16.msk.msra.mxu0 %vm691_vm10, %v792_v33  ;;  %vm388_vm14 = vmand %vm868_vm6, %vm878_vm8  ;;  %v319_v38 = vand.u32 3, %v301_v29  ;;  %v351_v39 = vshra.s32 %v301_v29, 2  ;;  %v299_v41 = vadd.s32 56, %v838_v1  ;;  %v316_v42 = vand.u32 3, %v298_v32 }
  0x1a   : > { %vm916_vm1 = vmpackc.low %vm388_vm14, %vm387_vm11  ;;  %v348_v43 = vshra.s32 %v298_v32, 2  ;;  %v296_v44 = vadd.s32 32, %v838_v1  ;;  %vm931_vm3 = vcmp.eq.s32.totalorder %v318_v30, 3  ;;  %vm936_vm4 = vcmp.eq.s32.totalorder %v350_v31, %v845_v5 }
  0x1b   : > { %vm385_vm2 = vmand %vm893_vm12, %vm898_vm13  ;;  %v297_v47 = vadd.s32 40, %v838_v1  ;;  %vm951_vm6 = vcmp.eq.s32.totalorder %v319_v38, 3  ;;  %vm956_vm7 = vcmp.eq.s32.totalorder %v351_v39, %v845_v5  ;;  %v317_v50 = vand.u32 3, %v299_v41 }
  0x1c   : > { %712 = vmatpush.bf16.msk.msra.mxu1 %vm916_vm1, %v792_v33  ;;  %728 = vmatpush.bf16.msk.msra.mxu2 %vm916_vm1, %v792_v33  ;;  %vm386_vm5 = vmand %vm907_vm15, %vm912_vm0  ;;  %v349_v51 = vshra.s32 %v299_v41, 2  ;;  %vm967_vm9 = vcmp.eq.s32.totalorder %v316_v42, 3  ;;  %v314_v54 = vand.u32 3, %v296_v44  ;;  %v346_v55 = vshra.s32 %v296_v44, 2 }
  0x1d   : > { %694 = vmatpush.bf16.msk.msra.mxu0 %vm916_vm1, %v792_v33  ;;  %vm963_vm8 = vmpackc.low %vm386_vm5, %vm385_vm2  ;;  %v294_v56 = vadd.s32 16, %v838_v1  ;;  %vm977_vm11 = vcmp.eq.s32.totalorder %v348_v43, %v845_v5  ;;  %v315_v58 = vand.u32 3, %v297_v47  ;;  %v347_v59 = vshra.s32 %v297_v47, 2 }
  0x1e   : > { %vm383_vm10 = vmand %vm931_vm3, %vm936_vm4  ;;  %v295_v60 = vadd.s32 24, %v838_v1  ;;  %vm989_vm13 = vcmp.eq.s32.totalorder %v317_v50, 3  ;;  %vm994_vm14 = vcmp.eq.s32.totalorder %v349_v51, %v845_v5  ;;  %vm1015_vm1 = vcmp.eq.s32.totalorder %v314_v54, 3 }
  0x1f   : > { %vm384_vm12 = vmand %vm951_vm6, %vm956_vm7  ;;  %vm1020_vm2 = vcmp.eq.s32.totalorder %v346_v55, %v845_v5  ;;  %v312_v4 = vand.u32 3, %v294_v56  ;;  %v344_v6 = vshra.s32 %v294_v56, 2  ;;  %vm1032_vm4 = vcmp.eq.s32.totalorder %v315_v58, 3 }
  0x20   : > { %714 = vmatpush.bf16.msk.msra.mxu1 %vm963_vm8, %v792_v33  ;;  %730 = vmatpush.bf16.msk.msra.mxu2 %vm963_vm8, %v792_v33  ;;  %vm1004_vm15 = vmpackc.low %vm384_vm12, %vm383_vm10  ;;  %vm1037_vm5 = vcmp.eq.s32.totalorder %v347_v59, %v845_v5  ;;  %v313_v9 = vand.u32 3, %v295_v60  ;;  %v345_v10 = vshra.s32 %v295_v60, 2  ;;  %v293_v12 = vadd.s32 8, %v838_v1 }
  0x21   : > { %696 = vmatpush.bf16.msk.msra.mxu0 %vm963_vm8, %v792_v33  ;;  %vm381_vm0 = vmand %vm967_vm9, %vm977_vm11  ;;  %vm1063_vm9 = vcmp.eq.s32.totalorder %v312_v4, 3  ;;  %vm1068_vm10 = vcmp.eq.s32.totalorder %v344_v6, %v845_v5  ;;  %v310_v18 = vand.u32 3, %v838_v1  ;;  %v342_v19 = vshra.s32 %v838_v1, 2 }
  0x22   : > { %vm382_vm3 = vmand %vm989_vm13, %vm994_vm14  ;;  %vm1072_vm11 = vcmp.eq.s32.totalorder %v313_v9, 3  ;;  %vm1077_vm12 = vcmp.eq.s32.totalorder %v345_v10, %v845_v5  ;;  %v311_v21 = vand.u32 3, %v293_v12  ;;  %v343_v22 = vshra.s32 %v293_v12, 2 }
  0x23   : > { %vm1041_vm6 = vmpackc.low %vm382_vm3, %vm381_vm0  ;;  %v449_v23 = vpack.c.bf16 %v290_v13, %v290_v13  ;;  %vm1104_vm0 = vcmp.eq.s32.totalorder %v310_v18, 3  ;;  %v483_v39 = vand.u32 3, %v840_v2 }
  0x24   : > { %716 = vmatpush.bf16.msk.msra.mxu1 %vm1004_vm15, %v792_v33  ;;  %732 = vmatpush.bf16.msk.msra.mxu2 %vm1004_vm15, %v792_v33  ;;  %vm379_vm7 = vmand %vm1015_vm1, %vm1020_vm2  ;;  %vm1109_vm1 = vcmp.eq.s32.totalorder %v342_v19, %v845_v5  ;;  %vm1113_vm2 = vcmp.eq.s32.totalorder %v311_v21, 3  ;;  %vm1118_vm3 = vcmp.eq.s32.totalorder %v343_v22, %v845_v5 }
  0x25   : > { %698 = vmatpush.bf16.msk.msra.mxu0 %vm1004_vm15, %v792_v33  ;;  %vm380_vm8 = vmand %vm1032_vm4, %vm1037_vm5  ;;  %v450_v27 = vunpack.c.l.bf16 %v449_v23 }
  0x26   : > { %vm1083_vm13 = vmpackc.low %vm380_vm8, %vm379_vm7  ;;  %vm431_vm8 = vcmp.gt.f32.partialorder %v289_v28, 0.0 }
  0x27   : > { %vm377_vm14 = vmand %vm1063_vm9, %vm1068_vm10  ;;  %v451_v5 = vsub.f32 %v290_v13, %v450_v27 }
  0x28   : > { %718 = vmatpush.bf16.msk.msra.mxu1 %vm1041_vm6, %v792_v33  ;;  %734 = vmatpush.bf16.msk.msra.mxu2 %vm1041_vm6, %v792_v33  ;;  %vm378_vm15 = vmand %vm1072_vm11, %vm1077_vm12  ;;  %vm484_vm11 = vcmp.eq.s32.totalorder %v483_v39, 3 }
  0x29   : > { %700 = vmatpush.bf16.msk.msra.mxu0 %vm1041_vm6, %v792_v33  ;;  %vm703_vm4 = vmpackc.low %vm378_vm15, %vm377_vm14  ;;  %v452_v29 = vpack.c.bf16 %v451_v5, %v451_v5 }
  0x2a   : > { %vm375_vm5 = vmand %vm1104_vm0, %vm1109_vm1 }
  0x2b   : > { %vm376_vm6 = vmand %vm1113_vm2, %vm1118_vm3 }
  0x2c   : > { %720 = vmatpush.bf16.msk.msra.mxu1 %vm1083_vm13, %v792_v33  ;;  %736 = vmatpush.bf16.msk.msra.mxu2 %vm1083_vm13, %v792_v33  ;;  %vm705_vm7 = vmpackc.low %vm376_vm6, %vm375_vm5 }
  0x2d   : > { %702 = vmatpush.bf16.msk.msra.mxu0 %vm1083_vm13, %v792_v33  ;;  %vm707_vm9 = vmpackc.low %vm431_vm8, %vm431_vm8 }
  0x30   : > { %722 = vmatpush.bf16.msk.msra.mxu1 %vm703_vm4, %v792_v33  ;;  %738 = vmatpush.bf16.msk.msra.mxu2 %vm703_vm4, %v792_v33 }
  0x31   : > { %704 = vmatpush.bf16.msk.msra.mxu0 %vm703_vm4, %v792_v33 }
  0x34   : > { %724 = vmatpush.bf16.msk.msra.mxu1 %vm705_vm7, %v792_v33  ;;  %740 = vmatpush.bf16.msk.msra.mxu2 %vm705_vm7, %v792_v33 }
  0x35   : > { %706 = vmatpush.bf16.msk.msra.mxu0 %vm705_vm7, %v792_v33 }
  0x37   : > { %461 = vmatmul.bf16.vlgmr.msra.gmra.mxu1 %v452_v29  ;;  %474 = vmatmul.bf16.vlgmr.msra.gmra.mxu2 %v449_v23 }
  0x38   : > { %708 = vmatmul.msk.bf16.vlgmr.msra.gmra.mxu0 %vm707_vm9, %v792_v33 }
  0xb4   : > { %v462_v30 = vpop.f32.mrf.mxu1 }
  0xb5   : > { %v444_v31 = vpop.f32.mrf.mxu0 }
  0xb6   : > { %vm448_vm10 = vcmp.gt.f32.partialorder %v444_v31, 0.5 }
  0xb7   : > { %v490_v32 = vsel %vm448_vm10, %v289_v28, 255.0 }
  0xb8   : > { %v491_v34 = vpack.c.bf16 %v490_v32, %v490_v32 }
  0xba   : > { %492 = vst [vmem:[%s288_s29] sm:$0xf] %v491_v34  ;;  %v475_v35 = vpop.f32.mrf.mxu2 }
  0xbb   : > { %v476_v36 = vadd.f32 %v475_v35, %v462_v30 }
  0xbc   : > { %v464_v37 = vpop.f32.mrf.mxu1 }
  0xbd   : > { %v479_v38 = vmul.f32 0.003921569, %v476_v36  ;;  %v446_v33 = vpop.f32.mrf.mxu0 }
  0xbf   : > { %v480_v40 = vmul.f32 %v479_v38, %v290_v13 }
  0xc1   : > { %v481_v41 = vadd.f32 %v480_v40, %v289_v28 }
  0xc2   : > { %v477_v42 = vpop.f32.mrf.mxu2 }
  0xc3   : > { %v482_v43 = vsel %vm448_vm10, %v481_v41, 0.0  ;;  %v487_v44 = vsel %vm448_vm10, %v481_v41, 255.0 }
  0xc4   : > { %v485_v45 = vsel %vm484_vm11, %v289_v28, %v482_v43  ;;  %v488_v46 = vpack.c.bf16 %v487_v44, %v487_v44 }
  0xc5   : > { %486 = vst [vmem:[%s274_s6] sm:$0xff] %v485_v45 }
  0xc6   : > { %489 = vst [vmem:[%s281_s9] sm:$0xf] %v488_v46 }
  0xc7 PF: > { %s15_s17 = sadd.s32 1, %s790_s17   ;;  %s1249_s15 = smov %s786_s16 }
  0xc8   : > { %p12_p5 = scmp.ge.s32.totalorder %s15_s17, 4   ;;  %s1250_s16 = smov %s1252_s18 }
  0xca   :  { %14 = sbr.rel (!%p12_p5) target bundleno = 2 (0x2), region = 85 }

</bundles_post_ra>
